<compile_context>
chip_gen: v6e
topology: v6e:2x2x1
jax: 0.10.0
libtpu: 0.0.40
codegen_flags: <defaults>
</compile_context>

<pallas_src>
import functools

import jax
import jax.numpy as jnp
from jax import lax
from jax.experimental import pallas as pl
from jax.experimental.pallas import tpu as pltpu


def _logsigmoid(x):
    # Numerically stable log(sigmoid(x)) = min(x, 0) - log1p(exp(-|x|)),
    # identical to torch.nn.functional.logsigmoid / jax.nn.log_sigmoid.
    return jnp.minimum(x, 0.0) - jnp.log1p(jnp.exp(-jnp.abs(x)))


def _nce_kernel(ref_ref, pos_ref, neg_ref, out_ref, acc_ref, *,
                inv_temperature, negative_weight, reduce, num_neg, tile_m):
    k = pl.program_id(1)

    @pl.when(k == 0)
    def _init():
        acc_ref[...] = jnp.zeros_like(acc_ref)

    # Fold 1/temperature into ref once; both dot products pick up the scale.
    r = ref_ref[...].astype(jnp.float32) * inv_temperature          # (tn, d)
    ng = neg_ref[...].astype(jnp.float32)                           # (tm, d)

    # s[j, i] = <neg_j, ref_i> / T  -- contract last dims, no transpose,
    # n on the lane axis.
    s = lax.dot_general(ng, r, (((1,), (1,)), ((), ())),
                        preferred_element_type=jnp.float32)         # (tm, tn)
    ls = _logsigmoid(-s)                                            # (tm, tn)

    # Mask padded negatives (logsigmoid(0) = -log 2 != 0).
    row = k * tile_m + lax.broadcasted_iota(jnp.int32, ls.shape, 0)
    ls = jnp.where(row < num_neg, ls, 0.0)

    # Reduce over negatives on the MXU -> lane-dense (1, tn) partial sum.
    ones_row = jnp.ones((1, ls.shape[0]), jnp.float32)
    partial = lax.dot_general(ones_row, ls, (((1,), (0,)), ((), ())),
                              preferred_element_type=jnp.float32)   # (1, tn)
    acc_ref[...] += partial

    @pl.when(k == pl.num_programs(1) - 1)
    def _finalize():
        uniform = acc_ref[...]                                      # (1, tn)
        if reduce == "mean":
            uniform = uniform * (1.0 / num_neg)

        # pos_dist_i = <ref_i, pos_i> / T = diag(pos @ ref_scaled^T); a small
        # (tn, tn) MXU product + diagonal extraction keeps the result
        # lane-dense (n on lanes) without any relayout/transpose.
        p = pos_ref[...].astype(jnp.float32)                        # (tn, d)
        t = lax.dot_general(p, r, (((1,), (1,)), ((), ())),
                            preferred_element_type=jnp.float32)     # (tn, tn)
        eye = (lax.broadcasted_iota(jnp.int32, t.shape, 0) ==
               lax.broadcasted_iota(jnp.int32, t.shape, 1))
        pos_dist = jnp.sum(jnp.where(eye, t, 0.0), axis=0, keepdims=True)
        align = _logsigmoid(pos_dist)                               # (1, tn)
        loss = align + negative_weight * uniform

        out_ref[0:1, :] = loss
        out_ref[1:2, :] = align
        out_ref[2:3, :] = uniform


def _round_up(x, mult):
    return ((x + mult - 1) // mult) * mult


def nce_loss(ref, pos, neg, *, temperature=1.0, negative_weight=1.0,
             reduce="mean", tile_n=256, tile_m=512):
    """Pallas-TPU NCE forward. Returns (loss, align, uniform), each shape (n,)."""
    assert reduce in ("mean", "sum")
    n, d = ref.shape
    m, d2 = neg.shape
    assert pos.shape == (n, d) and d2 == d

    # Tile sizes: when the n axis spans multiple tiles the output lane dim must
    # be a multiple of 128; for a single tile any multiple of 8 works.
    if n <= tile_n:
        tn = _round_up(n, 8)
    else:
        assert tile_n % 128 == 0, "tile_n must be a multiple of 128"
        tn = tile_n
    if m <= tile_m:
        tm = _round_up(m, 8)
    else:
        assert tile_m % 8 == 0, "tile_m must be a multiple of 8"
        tm = tile_m

    n_pad = _round_up(n, tn)
    m_pad = _round_up(m, tm)
    if n_pad != n:
        ref = jnp.pad(ref, ((0, n_pad - n), (0, 0)))
        pos = jnp.pad(pos, ((0, n_pad - n), (0, 0)))
    if m_pad != m:
        neg = jnp.pad(neg, ((0, m_pad - m), (0, 0)))

    grid = (n_pad // tn, m_pad // tm)

    kernel = functools.partial(
        _nce_kernel,
        inv_temperature=1.0 / float(temperature),
        negative_weight=float(negative_weight),
        reduce=reduce,
        num_neg=int(m),
        tile_m=int(tm),
    )

    itemsize = jnp.dtype(ref.dtype).itemsize
    cost = pl.CostEstimate(
        flops=2 * n * m * d + 2 * n * d,
        transcendentals=2 * n * m + 2 * n,
        bytes_accessed=(2 * n * d + m * d) * itemsize + 3 * n * 4,
    )

    out = pl.pallas_call(
        kernel,
        grid_spec=pltpu.PrefetchScalarGridSpec(
            num_scalar_prefetch=0,
            grid=grid,
            in_specs=[
                pl.BlockSpec((tn, d), lambda i, k: (i, 0)),   # ref: resident over k
                pl.BlockSpec((tn, d), lambda i, k: (i, 0)),   # pos: resident over k
                pl.BlockSpec((tm, d), lambda i, k: (k, 0)),   # neg: streamed over k
            ],
            out_specs=pl.BlockSpec((3, tn), lambda i, k: (0, i)),
            scratch_shapes=[pltpu.VMEM((1, tn), jnp.float32)],
        ),
        out_shape=jax.ShapeDtypeStruct((3, n_pad), jnp.float32),
        compiler_params=pltpu.CompilerParams(
            dimension_semantics=("parallel", "arbitrary")),
        cost_estimate=cost,
    )(ref, pos, neg)

    return out[0, :n], out[1, :n], out[2, :n]


def _nce_reference(ref, pos, neg, *, temperature=1.0, negative_weight=1.0,
                   reduce="mean"):
    """Pure-JAX reference mirroring the PyTorch forward."""
    pos_dist = jnp.einsum("ni,ni->n", ref, pos) / temperature
    neg_dist = jnp.einsum("ni,mi->nm", ref, neg) / temperature
    align = jax.nn.log_sigmoid(pos_dist)
    red = jnp.mean if reduce == "mean" else jnp.sum
    uniform = red(jax.nn.log_sigmoid(-neg_dist), axis=1)
    return align + negative_weight * uniform, align, uniform


if __name__ == "__main__":
    # Small shapes consistent with the module's (n, d) convention. m > tile_m
    # (passed below) exercises the multi-step reduction + padded-column mask;
    # n not a multiple of 8 exercises row padding/slicing.
    n, m, d = 12, 300, 32
    key = jax.random.PRNGKey(0)
    k1, k2, k3 = jax.random.split(key, 3)

    # Quantize demo inputs to the bf16 grid so MXU vs. VPU accumulation paths
    # agree with the pure-JAX reference to well within the tolerances below,
    # independent of the backend's default matmul precision.
    def _mk(k, shape):
        x = jax.random.normal(k, shape, dtype=jnp.float32)
        return x.astype(jnp.bfloat16).astype(jnp.float32)

    ref = _mk(k1, (n, d))
    pos = _mk(k2, (n, d))
    neg = _mk(k3, (m, d))

    for reduce, temperature, negative_weight in [("mean", 0.5, 2.0),
                                                 ("sum", 1.0, 1.0)]:
        loss, align, uniform = nce_loss(
            ref, pos, neg,
            temperature=temperature,
            negative_weight=negative_weight,
            reduce=reduce,
            tile_m=128,  # small tile so the m-reduction takes several grid steps
        )
        jax.block_until_ready((loss, align, uniform))

        loss_r, align_r, uniform_r = _nce_reference(
            ref, pos, neg,
            temperature=temperature,
            negative_weight=negative_weight,
            reduce=reduce,
        )
        assert jnp.allclose(loss, loss_r, atol=1e-4, rtol=1e-4)
        assert jnp.allclose(align, align_r, atol=1e-4, rtol=1e-4)
        assert jnp.allclose(uniform, uniform_r, atol=1e-4, rtol=1e-4)

    print("KERNEL_OK")
</pallas_src>

<mosaic_0001>
module attributes {stable_mosaic.version = 11 : i64} {
  func.func @_nce_kernel(%arg0: i32, %arg1: i32, %arg2: memref<16x32xf32, #tpu.memory_space<vmem>>, %arg3: memref<16x32xf32, #tpu.memory_space<vmem>>, %arg4: memref<128x32xf32, #tpu.memory_space<vmem>>, %arg5: memref<3x16xf32, #tpu.memory_space<vmem>>, %arg6: memref<1x16xf32, #tpu.memory_space<vmem>>) attributes {dimension_semantics = [#tpu.dimension_semantics<parallel>, #tpu.dimension_semantics<arbitrary>], iteration_bounds = array<i64: 1, 3>, scalar_prefetch = 0 : i64, scratch_operands = 1 : i64, tpu.core_type = #tpu.core_type<tc>, window_params = [{transform_indices = @transform_0, window_bounds = array<i64: 16, 32>}, {transform_indices = @transform_1, window_bounds = array<i64: 16, 32>}, {transform_indices = @transform_2, window_bounds = array<i64: 128, 32>}, {transform_indices = @transform_3, window_bounds = array<i64: 3, 16>}]} {
    %c0_i32 = arith.constant 0 : i32
    %0 = arith.cmpi eq, %arg1, %c0_i32 : i32
    %1 = arith.extui %0 : i1 to i32
    %c0_i32_0 = arith.constant 0 : i32
    %2 = arith.cmpi ne, %1, %c0_i32_0 : i32
    scf.if %2 {
      %cst_16 = arith.constant 0.000000e+00 : f32
      %34 = vector.broadcast %cst_16 : f32 to vector<1x16xf32>
      %c0_17 = arith.constant 0 : index
      %c0_18 = arith.constant 0 : index
      %35 = vector.load %arg6[%c0_17, %c0_18] : memref<1x16xf32, #tpu.memory_space<vmem>>, vector<1x16xf32>
      tpu.vector_store %arg6[%c0_17, %c0_18], %34 {strides = array<i32>} : memref<1x16xf32, #tpu.memory_space<vmem>>, vector<1x16xf32>,
    } else {
    }
    %c0 = arith.constant 0 : index
    %c0_1 = arith.constant 0 : index
    %3 = vector.load %arg2[%c0, %c0_1] : memref<16x32xf32, #tpu.memory_space<vmem>>, vector<16x32xf32>
    %cst = arith.constant 2.000000e+00 : f32
    %4 = vector.broadcast %cst : f32 to vector<16x32xf32>
    %5 = arith.mulf %3, %4 : vector<16x32xf32>
    %c0_2 = arith.constant 0 : index
    %c0_3 = arith.constant 0 : index
    %6 = vector.load %arg4[%c0_2, %c0_3] : memref<128x32xf32, #tpu.memory_space<vmem>>, vector<128x32xf32>
    %cst_4 = arith.constant dense<0.000000e+00> : vector<128x16xf32>
    %7 = tpu.matmul %6, %5, %cst_4 {dimension_numbers = #tpu.dot_dimension_numbers<[1], [1], [0], [0], [0, 0, 1, 0], [], []>} : vector<128x32xf32>, vector<16x32xf32>, vector<128x16xf32> -> vector<128x16xf32>
    %cst_5 = arith.constant 0.000000e+00 : f32
    %8 = vector.broadcast %cst_5 : f32 to vector<128x16xf32>
    %9 = arith.subf %8, %7 : vector<128x16xf32>
    %cst_6 = arith.constant 0.000000e+00 : f32
    %10 = vector.broadcast %cst_6 : f32 to vector<128x16xf32>
    %11 = arith.minimumf %9, %10 : vector<128x16xf32>
    %12 = math.absf %9 : vector<128x16xf32>
    %cst_7 = arith.constant 0.000000e+00 : f32
    %13 = vector.broadcast %cst_7 : f32 to vector<128x16xf32>
    %14 = arith.subf %13, %12 : vector<128x16xf32>
    %15 = math.exp %14 : vector<128x16xf32>
    %16 = math.log1p %15 : vector<128x16xf32>
    %17 = arith.subf %11, %16 : vector<128x16xf32>
    %c128_i32 = arith.constant 128 : i32
    %18 = arith.muli %arg1, %c128_i32 : i32
    %19 = tpu.iota {dimensions = array<i32: 0>} : vector<128x16xi32>
    %20 = vector.broadcast %18 : i32 to vector<128x16xi32>
    %21 = arith.addi %20, %19 : vector<128x16xi32>
    %c300_i32 = arith.constant 300 : i32
    %22 = vector.broadcast %c300_i32 : i32 to vector<128x16xi32>
    %23 = arith.cmpi slt, %21, %22 : vector<128x16xi32>
    %cst_8 = arith.constant 0.000000e+00 : f32
    %24 = vector.broadcast %cst_8 : f32 to vector<128x16xf32>
    %25 = arith.select %23, %17, %24 : vector<128x16xi1>, vector<128x16xf32>
    %cst_9 = arith.constant 1.000000e+00 : f32
    %26 = vector.broadcast %cst_9 : f32 to vector<1x128xf32>
    %cst_10 = arith.constant dense<0.000000e+00> : vector<1x16xf32>
    %27 = tpu.matmul %26, %25, %cst_10 {dimension_numbers = #tpu.dot_dimension_numbers<[1], [0], [0], [1], [0, 0, 1, 1], [], []>} : vector<1x128xf32>, vector<128x16xf32>, vector<1x16xf32> -> vector<1x16xf32>
    %c0_11 = arith.constant 0 : index
    %c0_12 = arith.constant 0 : index
    %28 = vector.load %arg6[%c0_11, %c0_12] : memref<1x16xf32, #tpu.memory_space<vmem>>, vector<1x16xf32>
    %29 = arith.addf %28, %27 : vector<1x16xf32>
    %c0_13 = arith.constant 0 : index
    %c0_14 = arith.constant 0 : index
    %30 = vector.load %arg6[%c0_13, %c0_14] : memref<1x16xf32, #tpu.memory_space<vmem>>, vector<1x16xf32>
    tpu.vector_store %arg6[%c0_13, %c0_14], %29 {strides = array<i32>} : memref<1x16xf32, #tpu.memory_space<vmem>>, vector<1x16xf32>,
    %c2_i32 = arith.constant 2 : i32
    %31 = arith.cmpi eq, %arg1, %c2_i32 : i32
    %32 = arith.extui %31 : i1 to i32
    %c0_i32_15 = arith.constant 0 : i32
    %33 = arith.cmpi ne, %32, %c0_i32_15 : i32
    scf.if %33 {
      %c0_16 = arith.constant 0 : index
      %c0_17 = arith.constant 0 : index
      %34 = vector.load %arg6[%c0_16, %c0_17] : memref<1x16xf32, #tpu.memory_space<vmem>>, vector<1x16xf32>
      %cst_18 = arith.constant 0.00333333341 : f32
      %35 = vector.broadcast %cst_18 : f32 to vector<1x16xf32>
      %36 = arith.mulf %34, %35 : vector<1x16xf32>
      %c0_19 = arith.constant 0 : index
      %c0_20 = arith.constant 0 : index
      %37 = vector.load %arg3[%c0_19, %c0_20] : memref<16x32xf32, #tpu.memory_space<vmem>>, vector<16x32xf32>
      %cst_21 = arith.constant dense<0.000000e+00> : vector<16x16xf32>
      %38 = tpu.matmul %37, %5, %cst_21 {dimension_numbers = #tpu.dot_dimension_numbers<[1], [1], [0], [0], [0, 0, 1, 0], [], []>} : vector<16x32xf32>, vector<16x32xf32>, vector<16x16xf32> -> vector<16x16xf32>
      %39 = tpu.iota {dimensions = array<i32: 0>} : vector<16x16xi32>
      %40 = tpu.iota {dimensions = array<i32: 1>} : vector<16x16xi32>
      %41 = arith.cmpi eq, %39, %40 : vector<16x16xi32>
      %cst_22 = arith.constant 0.000000e+00 : f32
      %42 = vector.broadcast %cst_22 : f32 to vector<16x16xf32>
      %43 = arith.select %41, %38, %42 : vector<16x16xi1>, vector<16x16xf32>
      %cst_23 = arith.constant dense<0.000000e+00> : vector<16xf32>
      %44 = vector.multi_reduction <add>, %43, %cst_23 [0] : vector<16x16xf32> to vector<16xf32>
      %45 = vector.shape_cast %44 : vector<16xf32> to vector<1x16xf32>
      %cst_24 = arith.constant 0.000000e+00 : f32
      %46 = vector.broadcast %cst_24 : f32 to vector<1x16xf32>
      %47 = arith.minimumf %45, %46 : vector<1x16xf32>
      %48 = math.absf %45 : vector<1x16xf32>
      %cst_25 = arith.constant 0.000000e+00 : f32
      %49 = vector.broadcast %cst_25 : f32 to vector<1x16xf32>
      %50 = arith.subf %49, %48 : vector<1x16xf32>
      %51 = math.exp %50 : vector<1x16xf32>
      %52 = math.log1p %51 : vector<1x16xf32>
      %53 = arith.subf %47, %52 : vector<1x16xf32>
      %cst_26 = arith.constant 2.000000e+00 : f32
      %54 = vector.broadcast %cst_26 : f32 to vector<1x16xf32>
      %55 = arith.mulf %54, %36 : vector<1x16xf32>
      %56 = arith.addf %53, %55 : vector<1x16xf32>
      %c0_27 = arith.constant 0 : index
      %c0_28 = arith.constant 0 : index
      %57 = vector.load %arg5[%c0_27, %c0_28] : memref<3x16xf32, #tpu.memory_space<vmem>>, vector<1x16xf32>
      tpu.vector_store %arg5[%c0_27, %c0_28], %56 {strides = array<i32>} : memref<3x16xf32, #tpu.memory_space<vmem>>, vector<1x16xf32>,
      %c1 = arith.constant 1 : index
      %c0_29 = arith.constant 0 : index
      %58 = vector.load %arg5[%c1, %c0_29] : memref<3x16xf32, #tpu.memory_space<vmem>>, vector<1x16xf32>
      tpu.vector_store %arg5[%c1, %c0_29], %53 {strides = array<i32>} : memref<3x16xf32, #tpu.memory_space<vmem>>, vector<1x16xf32>,
      %c2 = arith.constant 2 : index
      %c0_30 = arith.constant 0 : index
      %59 = vector.load %arg5[%c2, %c0_30] : memref<3x16xf32, #tpu.memory_space<vmem>>, vector<1x16xf32>
      tpu.vector_store %arg5[%c2, %c0_30], %36 {strides = array<i32>} : memref<3x16xf32, #tpu.memory_space<vmem>>, vector<1x16xf32>,
    } else {
    }
    return
  }
  func.func @transform_0(%arg0: i32, %arg1: i32) -> (i32, i32) {
    %c0_i32 = arith.constant 0 : i32
    %c0_i32_0 = arith.constant 0 : i32
    return %arg0, %c0_i32 : i32, i32
  }
  func.func @transform_1(%arg0: i32, %arg1: i32) -> (i32, i32) {
    %c0_i32 = arith.constant 0 : i32
    %c0_i32_0 = arith.constant 0 : i32
    return %arg0, %c0_i32 : i32, i32
  }
  func.func @transform_2(%arg0: i32, %arg1: i32) -> (i32, i32) {
    %c0_i32 = arith.constant 0 : i32
    %c0_i32_0 = arith.constant 0 : i32
    return %arg1, %c0_i32 : i32, i32
  }
  func.func @transform_3(%arg0: i32, %arg1: i32) -> (i32, i32) {
    %c0_i32 = arith.constant 0 : i32
    %c0_i32_0 = arith.constant 0 : i32
    return %c0_i32, %arg0 : i32, i32
  }
}

</mosaic_0001>

<bundles_post_ra>
// kernel: tpu_custom_call.1
= control target key start
LH: loop header
LB: loop body
LE: loop exit
PB: predicated region body
PF: predicated region fallthrough
CT: control target
= control target key end

     0   :  { %8 = vsyncpa [#allocation4], 0  ;;  %s1399_s12 = smov 0   ;;  %s1401_s13 = smov 0   ;;  %s1978_s0 = inlined_call_operand.vmem [shape: f32[16,32], index: 0, kind: input, shape index: {}]   ;;  %s1979_s1 = inlined_call_operand.vmem [shape: f32[16,32], index: 1, kind: input, shape index: {}]   ;;  %s1980_s2 = inlined_call_operand.vmem [shape: f32[384,32], index: 2, kind: input, shape index: {}]   ;;  %s1981_s3 = inlined_call_operand.hbm [shape: f32[3,16], index: 3, kind: output, shape index: {}]  }
   0x1   :  { %s1403_s14 = smov 0  }
   0x2 LB: > { %s1057_s15 = sadd.s32 4294967295, %s1372_s14   ;;  %s23_s16 = sadd.s32 1, %s1368_s13  ;;  %s1372_s14 = sphi %s1403_s14, %s14_s14   ;;  %s1368_s13 = sphi %s1401_s13, %s2099_s13   ;;  %s1364_s12 = sphi %s1399_s12, %s2098_s12  }
   0x3   : > { %p24_p0 = scmp.ge.s32.totalorder %s23_s16, 3  ;;  %p1062_p1 = scmp.ge.s32.totalorder %s1372_s14, 1 }
   0x4   : > { %p173_p2 = scmp.lt.s32.totalorder %s1372_s14, 4 }
   0x5   : > { %s2101_s16 = smov (%p24_p0, %s23_s16), 0 }
   0x6   : > { %p174_p3 = pnand %p1062_p1, %p173_p2 }
   0x8   : > { %177 = sbr.rel (%p174_p3) target bundleno = 804 (0x324), region = 32 }
   0xd   : > { %s1063_s17 = sshll.u32 %s1364_s12, 4  ;;  %p1065_p5 = scmp.ne.s32.totalorder %s1364_s12, 0 }
   0xe   : > { %p215_p4 = scmp.lt.s32.totalorder %s1063_s17, 47 }
   0xf   : > { %223 = sbr.rel (%p1065_p5) target bundleno = 22 (0x16), region = 36 }
  0x10   : > { %s2103_s17 = smov (!%p215_p4, %s1063_s17), 47 }
  0x11   : > { %s1064_s18 = sshll.u32 %s2103_s17, 3 }
  0x12   : > { %s1424_s21 = scalar_lea.vmem %s1980_s2, %s1064_s18 }
  0x14   : > { %vm224_vm0 = vcmask 122880   ;;  %v1374_v0 = vmov 0.0  }
  0x15   : > { %225 = vst.msk [vmem:[#allocation2] sm:$0x1] %vm224_vm0, %v1374_v0 }
  0x16 PF: > { %v227_v1 = vld [vmem:[%s1978_s0 + $0x8] sm:$0xff]  ;;  %vm246_vm1 = vcmask 261120   ;;  %v226_v2 = vld [vmem:[%s1978_s0] sm:$0xff]  ;;  %v232_v7 = vld [vmem:[%s1424_s21 + $0x10] sm:$0xff]  ;;  %v1991_v21 = vmov 0.0   ;;  %vm1376_vm2 = vmmov 0  }
  0x17   : > { %v230_v3 = vld [vmem:[%s1424_s21] sm:$0xff]  ;;  %v1434_v4 = vmul.f32 2.0, %v227_v1  ;;  %v1436_v5 = vmul.f32 2.0, %v226_v2  ;;  %v231_v6 = vld [vmem:[%s1424_s21 + $0x8] sm:$0xff]  ;;  %v233_v8 = vld [vmem:[%s1424_s21 + $0x18] sm:$0xff]  ;;  %1177 = vmatprep.subr.mxu1 %v1991_v21  ;;  %1209 = vmatprep.mubr.msk.f32.mxu1 %vm1376_vm2, %v1991_v21  ;;  %s1084_s26 = sshll.u32 %s1364_s12, 7 }
  0x18   : > { %1153 = vmatprep.mubr.msk.f32.mxu0 %vm246_vm1, %v230_v3  ;;  %v234_v9 = vld [vmem:[%s1424_s21 + $0x20] sm:$0xff]  ;;  %v235_v10 = vld [vmem:[%s1424_s21 + $0x28] sm:$0xff]  ;;  %v236_v11 = vld [vmem:[%s1424_s21 + $0x30] sm:$0xff]  ;;  %p1101_p6 = scmp.ne.s32.totalorder %s1364_s12, 2 }
  0x19   : > { %2014 = vst [vmem:[#allocation6_spill] sm:$0xff] %v1434_v4  ;;  %2015 = vst [vmem:[#allocation7_spill] sm:$0xff] %v1436_v5  ;;  %1149 = vmatprep.subr.msk.mxu0 %vm246_vm1, %v1434_v4  ;;  %v237_v12 = vld [vmem:[%s1424_s21 + $0x38] sm:$0xff]  ;;  %v238_v13 = vld [vmem:[%s1424_s21 + $0x40] sm:$0xff] }
  0x1a   : > { %1150 = vmatpush3.xpose.msk.msra.mxu0 %vm246_vm1, %v1434_v4  ;;  %v239_v14 = vld [vmem:[%s1424_s21 + $0x48] sm:$0xff]  ;;  %v240_v15 = vld [vmem:[%s1424_s21 + $0x50] sm:$0xff]  ;;  %v241_v16 = vld [vmem:[%s1424_s21 + $0x58] sm:$0xff] }
  0x1b   : > { %1151 = vmatprep.subr.msk.mxu0 %vm246_vm1, %v1436_v5  ;;  %v242_v17 = vld [vmem:[%s1424_s21 + $0x60] sm:$0xff]  ;;  %v243_v18 = vld [vmem:[%s1424_s21 + $0x68] sm:$0xff]  ;;  %v244_v19 = vld [vmem:[%s1424_s21 + $0x70] sm:$0xff] }
  0x1c   : > { %v245_v20 = vld [vmem:[%s1424_s21 + $0x78] sm:$0xff] }
  0x1e   : > { %1152 = vmatpush3.xpose.msk.msra.mxu0 %vm246_vm1, %v1436_v5 }
  0x21   : > { %1154 = vmatmul.mubr.msk.f32.vlgmr.msra.gmra.mxu0 %vm246_vm1, %v231_v6 }
  0x22   : > { %1156 = vmatprep.mubr.msk.f32.mxu0 %vm246_vm1, %v232_v7 }
  0x25   : > { %1157 = vmatmul.mubr.msk.f32.gmra.mxu0 %vm246_vm1, %v233_v8 }
  0x26   : > { %1159 = vmatprep.mubr.msk.f32.mxu0 %vm246_vm1, %v234_v9 }
  0x29   : > { %1160 = vmatmul.mubr.msk.f32.gmra.mxu0 %vm246_vm1, %v235_v10 }
  0x2a   : > { %1162 = vmatprep.mubr.msk.f32.mxu0 %vm246_vm1, %v236_v11 }
  0x2d   : > { %1163 = vmatmul.mubr.msk.f32.gmra.mxu0 %vm246_vm1, %v237_v12 }
  0x2e   : > { %1165 = vmatprep.mubr.msk.f32.mxu0 %vm246_vm1, %v238_v13 }
  0x31   : > { %1166 = vmatmul.mubr.msk.f32.gmra.mxu0 %vm246_vm1, %v239_v14 }
  0x32   : > { %1168 = vmatprep.mubr.msk.f32.mxu0 %vm246_vm1, %v240_v15 }
  0x35   : > { %1169 = vmatmul.mubr.msk.f32.gmra.mxu0 %vm246_vm1, %v241_v16 }
  0x36   : > { %1171 = vmatprep.mubr.msk.f32.mxu0 %vm246_vm1, %v242_v17 }
  0x39   : > { %1172 = vmatmul.mubr.msk.f32.gmra.mxu0 %vm246_vm1, %v243_v18 }
  0x3a   : > { %1174 = vmatprep.mubr.msk.f32.mxu0 %vm246_vm1, %v244_v19 }
  0x3d   : > { %1175 = vmatmul.mubr.msk.f32.gmra.mxu0 %vm246_vm1, %v245_v20 }
  0xe1   : > { %v1479_v22 = vpop.f32.mrf.mxu0 }
  0xe2   : > { %2016 = vst [vmem:[#allocation8_spill] sm:$0xff] %v1479_v22  ;;  %v1984_v33 = vsub.f32 0.0, %v1479_v22 }
  0xe3   : > { %v1481_v23 = vpop.f32.mrf.mxu0 }
  0xe4   : > { %2017 = vst [vmem:[#allocation9_spill] sm:$0xff] %v1481_v23  ;;  %v1983_v34 = vsub.f32 0.0, %v1481_v23  ;;  %v479_v37 = vand.u32 2147483647, %v1984_v33 }
  0xe5   : > { %v1483_v24 = vpop.f32.mrf.mxu0 }
  0xe6   : > { %2018 = vst [vmem:[#allocation10_spill] sm:$0xff] %v1483_v24  ;;  %v1986_v36 = vsub.f32 0.0, %v1483_v24  ;;  %v478_v38 = vand.u32 2147483647, %v1983_v34  ;;  %v495_v43 = vsub.f32 0.0, %v479_v37 }
  0xe7   : > { %v1485_v25 = vpop.f32.mrf.mxu0 }
  0xe8   : > { %2019 = vst [vmem:[#allocation11_spill] sm:$0xff] %v1485_v25  ;;  %v1985_v39 = vsub.f32 0.0, %v1485_v25  ;;  %v481_v42 = vand.u32 2147483647, %v1986_v36  ;;  %v494_v44 = vsub.f32 0.0, %v478_v38 }
  0xe9   : > { %v1487_v26 = vpop.f32.mrf.mxu0  ;;  %v512_v50 = vmul.f32 1.442695, %v495_v43 }
  0xea   : > { %2020 = vst [vmem:[#allocation12_spill] sm:$0xff] %v1487_v26  ;;  %v1988_v41 = vsub.f32 0.0, %v1487_v26  ;;  %v480_v45 = vand.u32 2147483647, %v1985_v39  ;;  %v497_v49 = vsub.f32 0.0, %v481_v42 }
  0xeb   : > { %v1489_v27 = vpop.f32.mrf.mxu0  ;;  %v510_v52 = vmul.f32 1.442695, %v494_v44  ;;  %1254 = vpow2.f32 %v512_v50 }
  0xec   : > { %2021 = vst [vmem:[#allocation13_spill] sm:$0xff] %v1489_v27  ;;  %v483_v47 = vand.u32 2147483647, %v1988_v41  ;;  %v496_v53 = vsub.f32 0.0, %v480_v45  ;;  %v516_v57 = vmul.f32 1.442695, %v497_v49 }
  0xed   : > { %v1491_v28 = vpop.f32.mrf.mxu0  ;;  %v1987_v59 = vsub.f32 0.0, %v1489_v27  ;;  %1256 = vpow2.f32 %v510_v52 }
  0xee   : > { %v499_v55 = vsub.f32 0.0, %v483_v47  ;;  %v514_v62 = vmul.f32 1.442695, %v496_v53  ;;  %v453_v63 = vsub.f32 0.0, %v1491_v28  ;;  %1258 = vpow2.f32 %v516_v57 }
  0xef   : > { %v1493_v29 = vpop.f32.mrf.mxu0  ;;  %v482_v11 = vand.u32 2147483647, %v1987_v59 }
  0xf0   : > { %v520_v2 = vmul.f32 1.442695, %v499_v55  ;;  %v452_v3 = vsub.f32 0.0, %v1493_v29  ;;  %1260 = vpow2.f32 %v514_v62  ;;  %v485_v15 = vand.u32 2147483647, %v453_v63 }
  0xf1   : > { %v1495_v30 = vpop.f32.mrf.mxu0  ;;  %v498_v44 = vsub.f32 0.0, %v482_v11 }
  0xf2   : > { %v455_v58 = vsub.f32 0.0, %v1495_v30  ;;  %1262 = vpow2.f32 %v520_v2  ;;  %v484_v18 = vand.u32 2147483647, %v452_v3  ;;  %v501_v53 = vsub.f32 0.0, %v485_v15 }
  0xf3   : > { %v1497_v31 = vpop.f32.mrf.mxu0  ;;  %v1982_v2 = vlaneseq }
  0xf4   : > { %v1997_v0 = vsub.f32 0.0, %v1497_v31  ;;  %v487_v8 = vand.u32 2147483647, %v455_v58  ;;  %v500_v55 = vsub.f32 0.0, %v484_v18  ;;  %v524_v11 = vmul.f32 1.442695, %v501_v53 }
  0xf5   : > { %v1499_v32 = vpop.f32.mrf.mxu0  ;;  %v1566_v15 = vshrl.u32 %v1982_v2, 7  ;;  %v2031_v5 = vsub.f32 0.0, %v1497_v31 }
  0xf6   : > { %v1996_v48 = vsub.f32 0.0, %v1499_v32  ;;  %v486_v16 = vand.u32 2147483647, %v1997_v0  ;;  %v503_v37 = vsub.f32 0.0, %v487_v8 }
  0xf7   : > { %v1503_v35 = vpop.f32.mrf.mxu0  ;;  %2023 = vst [vmem:[#allocation15_spill] sm:$0xff] %v1566_v15  ;;  %v710_v34 = vadd.s32 48, %v1566_v15  ;;  %v708_v36 = vadd.s32 32, %v1566_v15  ;;  %v1690_v4 = vmin.f32 %v2031_v5, 0.0 }
  0xf8   : > { %v1989_v51 = vsub.f32 0.0, %v1503_v35  ;;  %v489_v56 = vand.u32 2147483647, %v1996_v48  ;;  %v502_v47 = vsub.f32 0.0, %v486_v16 }
  0xf9   : > { %v1511_v40 = vpop.f32.mrf.mxu0  ;;  %2032 = vst [vmem:[#allocation23_spill] sm:$0xff] %v1690_v4 }
  0xfa   : > { %v488_v60 = vand.u32 2147483647, %v1989_v51  ;;  %v1993_v61 = vsub.f32 0.0, %v1511_v40  ;;  %v505_v6 = vsub.f32 0.0, %v489_v56  ;;  %v528_v56 = vmul.f32 1.442695, %v503_v37 }
  0xfb   : > { %v1518_v46 = vpop.f32.mrf.mxu0  ;;  %v717_v37 = vadd.s32 104, %v1566_v15  ;;  %v706_v51 = vadd.s32 16, %v1566_v15 }
  0xfc   : > { %v491_v7 = vand.u32 2147483647, %v1993_v61  ;;  %v1990_v9 = vsub.f32 0.0, %v1518_v46  ;;  %v504_v12 = vsub.f32 0.0, %v488_v60  ;;  %v532_v19 = vmul.f32 1.442695, %v505_v6  ;;  %v1559_v6 = vpop.eup %1254 }
  0xfd   : > { %v1524_v54 = vpop.f32.mrf.mxu0  ;;  %v518_v60 = vmul.f32 1.442695, %v498_v44  ;;  %v1561_v8 = vpop.eup %1256  ;;  %v551_v18 = vadd.f32 1.0, %v1559_v6  ;;  %v716_v44 = vadd.s32 96, %v1566_v15 }
  0xfe   : > { %v1995_v10 = vsub.f32 0.0, %v1524_v54  ;;  %v507_v13 = vsub.f32 0.0, %v491_v7  ;;  %v490_v17 = vand.u32 2147483647, %v1990_v9  ;;  %v530_v45 = vmul.f32 1.442695, %v504_v12 }
  0xff   : > { %v1535_v1 = vpop.f32.mrf.mxu0  ;;  %v526_v7 = vmul.f32 1.442695, %v502_v47  ;;  %2022 = vst [vmem:[#allocation14_spill] sm:$0xff] %v1561_v8  ;;  %v522_v12 = vmul.f32 1.442695, %v500_v55  ;;  %v2036_v25 = vsub.f32 0.0, %v1524_v54 }
 0x100   : > { %v1994_v14 = vsub.f32 0.0, %v1535_v1  ;;  %v536_v20 = vmul.f32 1.442695, %v507_v13  ;;  %v506_v38 = vsub.f32 0.0, %v490_v17  ;;  %v493_v42 = vand.u32 2147483647, %v1995_v10  ;;  %v1563_v13 = vpop.eup %1258 }
 0x101   : > { %v1568_v16 = vpop.eup %1260  ;;  %v569_v47 = vadd.f32 1.0, %v1563_v13 }
 0x102   : > { %v492_v43 = vand.u32 2147483647, %v1994_v14  ;;  %1264 = vpow2.f32 %v536_v20  ;;  %v534_v49 = vmul.f32 1.442695, %v506_v38  ;;  %v509_v50 = vsub.f32 0.0, %v493_v42  ;;  %v1571_v17 = vpop.eup %1262 }
 0x103   : > { %1266 = vpow2.f32 %v532_v19  ;;  %v719_v19 = vadd.s32 120, %v1566_v15  ;;  %v718_v20 = vadd.s32 112, %v1566_v15  ;;  %v542_v42 = vadd.f32 1.0, %v1561_v8 }
 0x104   : > { %v508_v52 = vsub.f32 0.0, %v492_v43  ;;  %1268 = vpow2.f32 %v534_v49  ;;  %v540_v57 = vmul.f32 1.442695, %v509_v50  ;;  %v1580_v43 = vstv %s1084_s26 }
 0x105   : > { %1270 = vpow2.f32 %v530_v45  ;;  %2024 = vst [vmem:[#allocation16_spill] sm:$0xff] %v1580_v43  ;;  %v715_v45 = vadd.s32 88, %v1566_v15  ;;  %v714_v49 = vadd.s32 80, %v1566_v15  ;;  %v1592_v55 = vadd.s32 %v1580_v43, %v719_v19 }
 0x106   : > { %v538_v62 = vmul.f32 1.442695, %v508_v52  ;;  %1272 = vpow2.f32 %v540_v57  ;;  %v1598_v57 = vadd.s32 %v1580_v43, %v717_v37  ;;  %v713_v19 = vadd.s32 72, %v1566_v15 }
 0x107   : > { %v587_v41 = vadd.f32 1.0, %v1571_v17  ;;  %v1652_v48 = vadd.s32 %v1580_v43, %v710_v34  ;;  %vm752_vm3 = vcmp.lt.s32.totalorder %v1592_v55, 300 }
 0x108   : > { %1274 = vpow2.f32 %v538_v62  ;;  %vm750_vm5 = vcmp.lt.s32.totalorder %v1598_v57, 300 }
 0x109   : > { %1276 = vpow2.f32 %v528_v56  ;;  %v1595_v56 = vadd.s32 %v1580_v43, %v718_v20  ;;  %v712_v20 = vadd.s32 64, %v1566_v15 }
 0x10a   : > { %1278 = vpow2.f32 %v518_v60 }
 0x10b   : > { %1280 = vpow2.f32 %v526_v7  ;;  %v1604_v7 = vadd.s32 %v1580_v43, %v716_v44  ;;  %v1643_v61 = vadd.s32 %v1580_v43, %v712_v20  ;;  %v1659_v20 = vadd.s32 %v1580_v43, %v708_v36 }
 0x10c   : > { %1282 = vpow2.f32 %v524_v11  ;;  %v1607_v11 = vadd.s32 %v1580_v43, %v715_v45  ;;  %v711_v45 = vadd.s32 56, %v1566_v15  ;;  %v1675_v36 = vmin.f32 %v453_v63, 0.0 }
 0x10d   : > { %1284 = vpow2.f32 %v522_v12  ;;  %v1697_v63 = vmul.f32 -0.5, %v1571_v17  ;;  %vm751_vm4 = vcmp.lt.s32.totalorder %v1595_v56, 300  ;;  %vm749_vm6 = vcmp.lt.s32.totalorder %v1604_v7, 300 }
 0x10e   : > { %1286 = vlog2.f32 %v551_v18  ;;  %v1612_v18 = vadd.s32 %v1580_v43, %v714_v49  ;;  %v1649_v10 = vadd.s32 %v1580_v43, %v711_v45  ;;  %v1666_v45 = vadd.s32 %v1580_v43, %v706_v51  ;;  %2028 = vst [vmem:[#allocation20_spill] sm:$0xff] %v1675_v36 }
 0x10f   : > { %v1577_v38 = vpop.eup %1264  ;;  %1288 = vlog2.f32 %v542_v42  ;;  %vm748_vm9 = vcmp.lt.s32.totalorder %v1607_v11, 300  ;;  %vm745_vm15 = vcmp.lt.s32.totalorder %v1643_v61, 300 }
 0x110   : > { %v1586_v50 = vpop.eup %1266  ;;  %v659_v52 = vadd.f32 1.0, %v1577_v38  ;;  %1290 = vlog2.f32 %v569_v47  ;;  %v560_v47 = vadd.f32 1.0, %v1568_v16  ;;  %2026 = vst [vmem:[#allocation18_spill] sm:$0xff] %v1666_v45  ;;  %v662_v28 = vmul.f32 -0.5, %v1577_v38 }
 0x111   : > { %v1589_v53 = vpop.eup %1268  ;;  %v641_v42 = vadd.f32 1.0, %v1586_v50  ;;  %v665_v27 = vand.u32 2147483647, %v1577_v38  ;;  %vm747_vm11 = vcmp.lt.s32.totalorder %v1612_v18, 300  ;;  %vm744_vm2 = vcmp.lt.s32.totalorder %v1649_v10, 300  ;;  %v2058_v18 = vld [vmem:[#allocation23_spill] sm:$0xff] }
 0x112   : > { %v1600_v60 = vpop.eup %1270  ;;  %v650_v62 = vadd.f32 1.0, %v1589_v53  ;;  %1292 = vlog2.f32 %v659_v52  ;;  %v709_v52 = vadd.s32 40, %v1566_v15  ;;  %v663_v45 = vadd.f32 1.0, %v662_v28 }
 0x113   : > { %v1609_v12 = vpop.eup %1272  ;;  %v632_v39 = vadd.f32 1.0, %v1600_v60  ;;  %vm1731_vm10 = vcmp.lt.f32.partialorder %v665_v27, 0.0004427343  ;;  %v638_v27 = vand.u32 2147483647, %v1600_v60 }
 0x114   : > { %v677_v44 = vadd.f32 1.0, %v1609_v12  ;;  %1294 = vlog2.f32 %v650_v62  ;;  %v707_v62 = vadd.s32 24, %v1566_v15  ;;  %v683_v22 = vand.u32 2147483647, %v1609_v12 }
 0x115   : > { %v1616_v37 = vpop.eup %1274  ;;  %v664_v8 = vmul.f32 %v1577_v38, %v663_v45  ;;  %vm1775_vm0 = vcmp.lt.f32.partialorder %v638_v27, 0.0004427343 }
 0x116   : > { %v1621_v2 = vpop.eup %1276  ;;  %v668_v49 = vadd.f32 1.0, %v1616_v37  ;;  %1296 = vlog2.f32 %v677_v44  ;;  %v1640_v44 = vadd.s32 %v1580_v43, %v713_v19  ;;  %v1656_v19 = vadd.s32 %v1580_v43, %v709_v52 }
 0x117   : > { %v1626_v33 = vpop.eup %1278  ;;  %v623_v21 = vadd.f32 1.0, %v1621_v2  ;;  %v1671_v52 = vadd.s32 8, %v1566_v15  ;;  %v671_v51 = vmul.f32 -0.5, %v1616_v37  ;;  %vm684_vm7 = vcmp.lt.f32.partialorder %v683_v22, 0.0004427343 }
 0x118   : > { %v1631_v59 = vpop.eup %1280  ;;  %1298 = vlog2.f32 %v668_v49  ;;  %v578_v49 = vadd.f32 1.0, %v1626_v33  ;;  %vm746_vm13 = vcmp.lt.s32.totalorder %v1640_v44, 300  ;;  %v2063_v44 = vld [vmem:[#allocation20_spill] sm:$0xff] }
 0x119   : > { %v1636_v9 = vpop.eup %1282  ;;  %1300 = vlog2.f32 %v641_v42  ;;  %v614_v0 = vadd.f32 1.0, %v1631_v59  ;;  %2027 = vst [vmem:[#allocation19_spill] sm:$0xff] %v1671_v52 }
 0x11a   : > { %v1645_v14 = vpop.eup %1284  ;;  %1302 = vlog2.f32 %v560_v47  ;;  %v605_v42 = vadd.f32 1.0, %v1636_v9  ;;  %v1663_v47 = vadd.s32 %v1580_v43, %v707_v62  ;;  %v1707_v5 = vmul.f32 -0.5, %v1636_v9 }
 0x11b   : > { %1304 = vlog2.f32 %v632_v39  ;;  %v596_v34 = vadd.f32 1.0, %v1645_v14  ;;  %v680_v39 = vmul.f32 -0.5, %v1609_v12  ;;  %v1682_v62 = vpop.eup %1286  ;;  %v477_v43 = vmin.f32 %v2036_v25, 0.0 }
 0x11c   : > { %1306 = vlog2.f32 %v587_v41  ;;  %2025 = vst [vmem:[#allocation17_spill] sm:$0xff] %v1663_v47  ;;  %v1679_v41 = vmin.f32 %v452_v3, 0.0  ;;  %2030 = vst [vmem:[#allocation22_spill] sm:$0xff] %v1682_v62  ;;  %v1694_v29 = vpop.eup %1288  ;;  %v2034_v3 = vsub.f32 0.0, %v1499_v32  ;;  %v617_v32 = vmul.f32 -0.5, %v1631_v59 }
 0x11d   : > { %1308 = vlog2.f32 %v623_v21  ;;  %v1686_v21 = vmin.f32 %v455_v58, 0.0  ;;  %2033 = vst [vmem:[#allocation24_spill] sm:$0xff] %v1694_v29  ;;  %v644_v58 = vmul.f32 -0.5, %v1586_v50  ;;  %v1704_v31 = vpop.eup %1290  ;;  %v647_v62 = vand.u32 2147483647, %v1586_v50 }
 0x11e   : > { %1310 = vlog2.f32 %v578_v49  ;;  %2029 = vst [vmem:[#allocation21_spill] sm:$0xff] %v1679_v41  ;;  %v1701_v30 = vmin.f32 %v2034_v3, 0.0  ;;  %2035 = vst [vmem:[#allocation25_spill] sm:$0xff] %v1704_v31  ;;  %v681_v49 = vadd.f32 1.0, %v680_v39  ;;  %v672_v3 = vadd.f32 1.0, %v671_v51 }
 0x11f   : > { %1312 = vlog2.f32 %v614_v0  ;;  %v653_v0 = vmul.f32 -0.5, %v1589_v53  ;;  %v1293_v23 = vpop.eup %1292  ;;  %v674_v39 = vand.u32 2147483647, %v1616_v37  ;;  %v645_v24 = vadd.f32 1.0, %v644_v58 }
 0x120   : > { %1314 = vlog2.f32 %v605_v42  ;;  %v626_v42 = vmul.f32 -0.5, %v1621_v2  ;;  %v635_v51 = vmul.f32 -0.5, %v1600_v60  ;;  %v661_v28 = vmul.f32 0.6931472, %v1293_v23 }
 0x121   : > { %1316 = vlog2.f32 %v596_v34  ;;  %v1295_v15 = vpop.eup %1294  ;;  %v2037_v34 = vsub.f32 0.0, %v1535_v1  ;;  %v654_v26 = vadd.f32 1.0, %v653_v0  ;;  %v682_v25 = vmul.f32 %v1609_v12, %v681_v49 }
 0x122   : > { %v673_v58 = vmul.f32 %v1616_v37, %v672_v3  ;;  %v652_v47 = vmul.f32 0.6931472, %v1295_v15  ;;  %vm675_vm8 = vcmp.lt.f32.partialorder %v674_v39, 0.0004427343  ;;  %v636_v12 = vadd.f32 1.0, %v635_v51 }
 0x123   : > { %v476_v52 = vmin.f32 %v2037_v34, 0.0  ;;  %v1297_v29 = vpop.eup %1296  ;;  %v656_v34 = vand.u32 2147483647, %v1589_v53  ;;  %v667_v37 = vsel %vm1731_vm10, %v664_v8, %v661_v28  ;;  %v655_v15 = vmul.f32 %v1589_v53, %v654_v26 }
 0x124   : > { %v679_v54 = vmul.f32 0.6931472, %v1297_v29  ;;  %v599_v3 = vmul.f32 -0.5, %v1645_v14  ;;  %v2040_v39 = vsub.f32 0.0, %v1511_v40  ;;  %v627_v26 = vadd.f32 1.0, %v626_v42 }
 0x125   : > { %v1299_v41 = vpop.eup %1298  ;;  %vm1745_vm12 = vcmp.lt.f32.partialorder %v656_v34, 0.0004427343  ;;  %v646_v53 = vmul.f32 %v1586_v50, %v645_v24  ;;  %v2043_v28 = vmov 0.0   ;;  %vm1759_vm14 = vcmp.lt.f32.partialorder %v647_v62, 0.0004427343  ;;  %v2069_v61 = vld [vmem:[#allocation21_spill] sm:$0xff] }
 0x126   : > { %v1301_v1 = vpop.eup %1300  ;;  %v670_v31 = vmul.f32 0.6931472, %v1299_v41  ;;  %v685_v23 = vsel %vm684_vm7, %v682_v25, %v679_v54  ;;  %v658_v51 = vsel %vm1745_vm12, %v655_v15, %v652_v47  ;;  %v629_v54 = vand.u32 2147483647, %v1621_v2 }
 0x127   : > { %v1727_v36 = vpop.eup %1302  ;;  %v701_v41 = vsub.f32 %v477_v43, %v685_v23  ;;  %v643_v22 = vmul.f32 0.6931472, %v1301_v1  ;;  %v2046_v42 = vsub.f32 0.0, %v1518_v46  ;;  %v618_v47 = vadd.f32 1.0, %v617_v32 }
 0x128   : > { %v1305_v29 = vpop.eup %1304  ;;  %v676_v49 = vsel %vm675_vm8, %v673_v58, %v670_v31  ;;  %v475_v31 = vmin.f32 %v2040_v39, 0.0  ;;  %v637_v58 = vmul.f32 %v1600_v60, %v636_v12  ;;  %v620_v23 = vand.u32 2147483647, %v1631_v59 }
 0x129   : > { %v1735_v4 = vpop.eup %1306  ;;  %v700_v38 = vsub.f32 %v476_v52, %v676_v49  ;;  %1178 = vmatpush3.msk.msra.mxu1 %vm752_vm3, %v701_v41  ;;  %v634_v52 = vmul.f32 0.6931472, %v1305_v29  ;;  %v474_v1 = vmin.f32 %v2046_v42, 0.0  ;;  %v649_v34 = vsel %vm1759_vm14, %v646_v53, %v643_v22  ;;  %v2059_v42 = vld [vmem:[#allocation17_spill] sm:$0xff] }
 0x12a   : > { %v1309_v45 = vpop.eup %1308  ;;  %1179 = vmatprep.subr.mxu1 %v2043_v28  ;;  %v699_v55 = vsub.f32 %v475_v31, %v667_v37  ;;  %v2047_v46 = vsub.f32 0.0, %v1503_v35  ;;  %v609_v60 = vadd.f32 1.0, %v1707_v5  ;;  %v628_v12 = vmul.f32 %v1621_v2, %v627_v26  ;;  %v2081_v26 = vld [vmem:[#allocation16_spill] sm:$0xff] }
 0x12b   : > { %v1751_v8 = vpop.eup %1310  ;;  %1180 = vmatpush3.msk.msra.mxu1 %vm751_vm4, %v700_v38  ;;  %v625_v50 = vmul.f32 0.6931472, %v1309_v45  ;;  %v698_v32 = vsub.f32 %v474_v1, %v658_v51  ;;  %v640_v49 = vsel %vm1775_vm0, %v637_v58, %v634_v52  ;;  %v581_v35 = vmul.f32 -0.5, %v1626_v33  ;;  %v2060_v1 = vld [vmem:[#allocation14_spill] sm:$0xff] }
 0x12c   : > { %v1313_v40 = vpop.eup %1312  ;;  %1181 = vmatprep.subr.mxu1 %v2043_v28  ;;  %v472_v29 = vmin.f32 %v2047_v46, 0.0  ;;  %v611_v41 = vand.u32 2147483647, %v1636_v9  ;;  %vm1789_vm3 = vcmp.lt.f32.partialorder %v629_v54, 0.0004427343  ;;  %v697_v57 = vsub.f32 %v1701_v30, %v649_v34  ;;  %v2075_v30 = vld [vmem:[#allocation10_spill] sm:$0xff] }
 0x12d   : > { %v1315_v24 = vpop.eup %1314  ;;  %1182 = vmatpush3.msk.msra.mxu1 %vm750_vm5, %v699_v55  ;;  %v616_v0 = vmul.f32 0.6931472, %v1313_v40  ;;  %v600_v5 = vadd.f32 1.0, %v599_v3  ;;  %v631_v37 = vsel %vm1789_vm3, %v628_v12, %v625_v50  ;;  %v619_v15 = vmul.f32 %v1631_v59, %v618_v47 }
 0x12e   : > { %v1317_v62 = vpop.eup %1316  ;;  %1183 = vmatprep.subr.mxu1 %v2043_v28  ;;  %v607_v2 = vmul.f32 0.6931472, %v1315_v24  ;;  %vm743_vm4 = vcmp.lt.s32.totalorder %v1652_v48, 300  ;;  %v572_v38 = vmul.f32 -0.5, %v1563_v13  ;;  %v602_v45 = vand.u32 2147483647, %v1645_v14 }
 0x12f   : > { %1184 = vmatpush3.msk.msra.mxu1 %vm749_vm6, %v698_v32  ;;  %vm1803_vm5 = vcmp.lt.f32.partialorder %v620_v23, 0.0004427343  ;;  %v696_v7 = vsub.f32 %v472_v29, %v640_v49  ;;  %v591_v3 = vadd.f32 1.0, %v1697_v63  ;;  %v610_v59 = vmul.f32 %v1636_v9, %v609_v60  ;;  %v2065_v29 = vld [vmem:[#allocation12_spill] sm:$0xff] }
 0x130   : > { %1185 = vmatprep.subr.mxu1 %v2043_v28  ;;  %v598_v27 = vmul.f32 0.6931472, %v1317_v62  ;;  %v622_v39 = vsel %vm1803_vm5, %v619_v15, %v616_v0  ;;  %vm742_vm6 = vcmp.lt.s32.totalorder %v1656_v19, 300  ;;  %v563_v31 = vmul.f32 -0.5, %v1568_v16 }
 0x131   : > { %1186 = vmatpush3.msk.msra.mxu1 %vm748_vm9, %v697_v57  ;;  %v593_v43 = vand.u32 2147483647, %v1571_v17  ;;  %vm1817_vm7 = vcmp.lt.f32.partialorder %v611_v41, 0.0004427343  ;;  %v695_v11 = vsub.f32 %v1686_v21, %v631_v37  ;;  %v589_v9 = vmul.f32 0.6931472, %v1735_v4 }
 0x132   : > { %1187 = vmatprep.subr.mxu1 %v2043_v28  ;;  %v582_v63 = vadd.f32 1.0, %v581_v35  ;;  %v613_v53 = vsel %vm1817_vm7, %v610_v59, %v607_v2  ;;  %v601_v52 = vmul.f32 %v1645_v14, %v600_v5  ;;  %vm741_vm8 = vcmp.lt.s32.totalorder %v1659_v20, 300  ;;  %v2072_v2 = vld [vmem:[#allocation13_spill] sm:$0xff]  ;;  %v2087_v21 = vld [vmem:[#allocation15_spill] sm:$0xff] }
 0x133   : > { %1188 = vmatpush3.msk.msra.mxu1 %vm747_vm11, %v696_v7  ;;  %v554_v51 = vmul.f32 -0.5, %v1559_v6  ;;  %v584_v40 = vand.u32 2147483647, %v1626_v33  ;;  %vm1832_vm9 = vcmp.lt.f32.partialorder %v602_v45, 0.0004427343  ;;  %v694_v4 = vsub.f32 %v2058_v18, %v622_v39  ;;  %v2079_v39 = vld [vmem:[#allocation24_spill] sm:$0xff] }
 0x134   : > { %1189 = vmatprep.subr.mxu1 %v2043_v28  ;;  %v573_v54 = vadd.f32 1.0, %v572_v38  ;;  %v592_v14 = vmul.f32 %v1571_v17, %v591_v3  ;;  %v580_v25 = vmul.f32 0.6931472, %v1751_v8  ;;  %v604_v55 = vsel %vm1832_vm9, %v601_v52, %v598_v27  ;;  %v2064_v17 = vld [vmem:[#allocation25_spill] sm:$0xff] }
 0x135   : > { %1190 = vmatpush3.msk.msra.mxu1 %vm746_vm13, %v695_v11  ;;  %vm740_vm10 = vcmp.lt.s32.totalorder %v2059_v42, 300  ;;  %v545_v24 = vmul.f32 -0.5, %v2060_v1  ;;  %v575_v50 = vand.u32 2147483647, %v1563_v13  ;;  %vm1847_vm11 = vcmp.lt.f32.partialorder %v593_v43, 0.0004427343 }
 0x136   : > { %1191 = vmatprep.subr.mxu1 %v2043_v28  ;;  %v693_v34 = vsub.f32 %v2063_v44, %v613_v53  ;;  %v571_v8 = vmul.f32 0.6931472, %v2064_v17  ;;  %v564_v58 = vadd.f32 1.0, %v563_v31  ;;  %v595_v62 = vsel %vm1847_vm11, %v592_v14, %v589_v9  ;;  %v2080_v43 = vld [vmem:[#allocation19_spill] sm:$0xff]  ;;  %v839_v42 = vld [vmem:[#allocation2] sm:$0x1] }
 0x137   : > { %1192 = vmatpush3.msk.msra.mxu1 %vm745_vm15, %v694_v4  ;;  %v583_v23 = vmul.f32 %v1626_v33, %v582_v63  ;;  %v566_v46 = vand.u32 2147483647, %v1568_v16  ;;  %v2066_v56 = vsub.f32 0.0, %v2065_v29  ;;  %vm1862_vm12 = vcmp.lt.f32.partialorder %v584_v40, 0.0004427343  ;;  %v2084_v53 = vld [vmem:[#allocation11_spill] sm:$0xff] }
 0x138   : > { %1193 = vmatprep.subr.mxu1 %v2043_v28  ;;  %v692_v12 = vsub.f32 %v2069_v61, %v604_v55  ;;  %v555_v0 = vadd.f32 1.0, %v554_v51  ;;  %v574_v49 = vmul.f32 %v1563_v13, %v573_v54  ;;  %v562_v33 = vmul.f32 0.6931472, %v1727_v36  ;;  %v2074_v13 = vld [vmem:[#allocation22_spill] sm:$0xff]  ;;  %v2088_v4 = vld [vmem:[#allocation8_spill] sm:$0xff] }
 0x139   : > { %v467_v32 = vmin.f32 %v2066_v56, 0.0  ;;  %1194 = vmatpush3.msk.msra.mxu1 %vm744_vm2, %v693_v34  ;;  %v586_v35 = vsel %vm1862_vm12, %v583_v23, %v580_v25  ;;  %v557_v41 = vand.u32 2147483647, %v1559_v6  ;;  %vm1875_vm13 = vcmp.lt.f32.partialorder %v575_v50, 0.0004427343  ;;  %v2086_v40 = vld [vmem:[#allocation18_spill] sm:$0xff] }
 0x13a   : > { %1195 = vmatprep.subr.mxu1 %v2043_v28  ;;  %v2073_v10 = vsub.f32 0.0, %v2072_v2  ;;  %v553_v36 = vmul.f32 0.6931472, %v2074_v13  ;;  %v546_v37 = vadd.f32 1.0, %v545_v24  ;;  %v577_v15 = vsel %vm1875_vm13, %v574_v49, %v571_v8 }
 0x13b   : > { %v691_v57 = vsub.f32 %v467_v32, %v595_v62  ;;  %1196 = vmatpush3.msk.msra.mxu1 %vm743_vm4, %v692_v12  ;;  %v565_v38 = vmul.f32 %v1568_v16, %v564_v58  ;;  %v548_v45 = vand.u32 2147483647, %v2060_v1  ;;  %v2076_v7 = vsub.f32 0.0, %v2075_v30 }
 0x13c   : > { %v466_v5 = vmin.f32 %v2073_v10, 0.0  ;;  %1197 = vmatprep.subr.mxu1 %v2043_v28  ;;  %vm1891_vm14 = vcmp.lt.f32.partialorder %v566_v46, 0.0004427343  ;;  %v556_v27 = vmul.f32 %v1559_v6, %v555_v0  ;;  %v544_v31 = vmul.f32 0.6931472, %v2079_v39 }
 0x13d   : > { %v465_v3 = vmin.f32 %v2076_v7, 0.0  ;;  %1198 = vmatpush3.msk.msra.mxu1 %vm742_vm6, %v691_v57  ;;  %v568_v16 = vsel %vm1891_vm14, %v565_v38, %v562_v33  ;;  %v722_v11 = vadd.s32 %v2081_v26, %v2080_v43  ;;  %vm1904_vm15 = vcmp.lt.f32.partialorder %v557_v41, 0.0004427343 }
 0x13e   : > { %v690_v48 = vsub.f32 %v466_v5, %v586_v35  ;;  %1199 = vmatprep.subr.mxu1 %v2043_v28  ;;  %v2085_v19 = vsub.f32 0.0, %v2084_v53  ;;  %v559_v6 = vsel %vm1904_vm15, %v556_v27, %v553_v36  ;;  %v547_v51 = vmul.f32 %v2060_v1, %v546_v37  ;;  %v2090_v1 = vld [vmem:[#allocation9_spill] sm:$0xff] }
 0x13f   : > { %v689_v63 = vsub.f32 %v465_v3, %v577_v15  ;;  %vm739_vm0 = vcmp.lt.s32.totalorder %v2086_v40, 300  ;;  %v721_v18 = vadd.s32 %v2081_v26, %v2087_v21  ;;  %v2089_v54 = vsub.f32 0.0, %v2088_v4 }
 0x140   : > { %v464_v52 = vmin.f32 %v2085_v19, 0.0  ;;  %1200 = vmatpush3.msk.msra.mxu1 %vm741_vm8, %v690_v48  ;;  %vm549_vm2 = vcmp.lt.f32.partialorder %v548_v45, 0.0004427343  ;;  %vm738_vm3 = vcmp.lt.s32.totalorder %v722_v11, 300  ;;  %v2091_v24 = vsub.f32 0.0, %v2090_v1 }
 0x141   : > { %1201 = vmatprep.subr.mxu1 %v2043_v28  ;;  %v463_v14 = vmin.f32 %v2089_v54, 0.0  ;;  %v550_v20 = vsel %vm549_vm2, %v547_v51, %v544_v31  ;;  %vm737_vm4 = vcmp.lt.s32.totalorder %v721_v18, 300  ;;  %v1377_v44 = vmov 1.0  }
 0x142   : > { %v688_v25 = vsub.f32 %v464_v52, %v568_v16  ;;  %1202 = vmatpush3.msk.msra.mxu1 %vm740_vm10, %v689_v63  ;;  %v462_v50 = vmin.f32 %v2091_v24, 0.0  ;;  %vm841_vm5 = vcmask 122880  }
 0x143   : > { %1203 = vmatprep.subr.mxu1 %v2043_v28  ;;  %v687_v55 = vsub.f32 %v463_v14, %v559_v6 }
 0x144   : > { %1204 = vmatpush3.msk.msra.mxu1 %vm739_vm0, %v688_v25  ;;  %v686_v47 = vsub.f32 %v462_v50, %v550_v20 }
 0x145   : > { %1205 = vmatprep.subr.mxu1 %v2043_v28 }
 0x146   : > { %1206 = vmatpush3.msk.msra.mxu1 %vm738_vm3, %v687_v55 }
 0x147   : > { %1207 = vmatprep.subr.mxu1 %v2043_v28 }
 0x148   : > { %1208 = vmatpush3.msk.msra.mxu1 %vm737_vm4, %v686_v47 }
 0x149   : > { %1210 = vmatmul.mubr.f32.vlgmr.msra.gmra.mxu1 %v1377_v44 }
 0x208   : > { %846 = sbr.rel (%p1101_p6) target bundleno = 789 (0x315), region = 40 }
 0x209   : > { %v835_v34 = vpop.f32.mrf.mxu1 }
 0x20a   : > { %v840_v17 = vadd.f32 %v839_v42, %v835_v34 }
 0x20b   : > { %v1211_v8 = vpop.f32.mrf.mxu1 }
 0x20c   : > { %842 = vst.msk [vmem:[#allocation2] sm:$0x1] %vm841_vm5, %v840_v17 }
 0x20d   : > { %v2092_v58 = vld [vmem:[#allocation6_spill] sm:$0xff]  ;;  %v2093_v62 = vld [vmem:[#allocation7_spill] sm:$0xff]  ;;  %v2094_v56 = vlaneseq  ;;  %vm938_vm8 = vcmask 130048  }
 0x20e   : > { %1212 = vmatprep.subr.msk.mxu0 %vm246_vm1, %v2092_v58  ;;  %v849_v28 = vld [vmem:[%s1979_s1] sm:$0xff]  ;;  %v850_v23 = vld [vmem:[%s1979_s1 + $0x8] sm:$0xff] }
 0x20f   : > { %1213 = vmatpush3.xpose.msk.msra.mxu0 %vm246_vm1, %v2092_v58  ;;  %1216 = vmatprep.mubr.msk.f32.mxu0 %vm246_vm1, %v849_v28  ;;  %v933_v32 = vand.u32 127, %v2094_v56  ;;  %v2095_v60 = vld [vmem:[#allocation19_spill] sm:$0xff] }
 0x210   : > { %1214 = vmatprep.subr.msk.mxu0 %vm246_vm1, %v2093_v62  ;;  %v2096_v12 = vld [vmem:[#allocation15_spill] sm:$0xff] }
 0x211   : > { %vm935_vm6 = vcmp.eq.s32.totalorder %v2095_v60, %v933_v32  ;;  %vm934_vm7 = vcmp.eq.s32.totalorder %v2096_v12, %v933_v32 }
 0x213   : > { %1215 = vmatpush3.xpose.msk.msra.mxu0 %vm246_vm1, %v2093_v62  ;;  %v847_v46 = vld [vmem:[#allocation2] sm:$0x1] }
 0x214   : > { %v848_v29 = vmul.f32 0.0033333334, %v847_v46 }
 0x216   : > { %1217 = vmatmul.mubr.msk.f32.vlgmr.msra.gmra.mxu0 %vm246_vm1, %v850_v23  ;;  %967 = vst.msk [vmem:[#allocation3 + $0x2] sm:$0x1] %vm841_vm5, %v848_v29  ;;  %v963_v16 = vmul.f32 2.0, %v848_v29 }
 0x2d6   : > { %v1218_v61 = vpop.f32.mrf.mxu0 }
 0x2d7   : > { %v937_v0 = vsel %vm935_vm6, %v1218_v61, 0.0 }
 0x2d8   : > { %v923_v49 = vpop.f32.mrf.mxu0  ;;  %v940_v35 = vsel %vm938_vm8, %v937_v0, 0.0 }
 0x2d9   : > { %v936_v33 = vsel %vm934_vm7, %v923_v49, 0.0 }
 0x2da   : > { %v939_v41 = vsel %vm938_vm8, %v936_v33, 0.0 }
 0x2db   : > { %v941_v22 = vadd.f32 %v940_v35, %v939_v41 }
 0x2dd   : > { %v942_v57 = vrot.slane %v941_v22, 4 }
 0x2df   : > { %v943_v2 = vadd.f32 %v942_v57, %v941_v22 }
 0x2e1   : > { %v944_v10 = vrot.slane %v943_v2, 2 }
 0x2e3   : > { %v945_v5 = vadd.f32 %v944_v10, %v943_v2 }
 0x2e5   : > { %v946_v13 = vrot.slane %v945_v5, 1 }
 0x2e7   : > { %v947_v36 = vadd.f32 %v946_v13, %v945_v5 }
 0x2e9   : > { %v949_v37 = vand.u32 2147483647, %v947_v36  ;;  %v948_v31 = vmin.f32 %v947_v36, 0.0 }
 0x2eb   : > { %v950_v15 = vsub.f32 0.0, %v949_v37 }
 0x2ed   : > { %v951_v38 = vmul.f32 1.442695, %v950_v15 }
 0x2ef   : > { %1318 = vpow2.f32 %v951_v38 }
 0x2fc   : > { %v1319_v45 = vpop.eup %1318 }
 0x2fd   : > { %v953_v30 = vadd.f32 1.0, %v1319_v45  ;;  %v956_v7 = vmul.f32 -0.5, %v1319_v45  ;;  %v959_v59 = vand.u32 2147483647, %v1319_v45 }
 0x2ff   : > { %1320 = vlog2.f32 %v953_v30  ;;  %v957_v3 = vadd.f32 1.0, %v956_v7  ;;  %vm960_vm1 = vcmp.lt.f32.partialorder %v959_v59, 0.0004427343 }
 0x301   : > { %v958_v39 = vmul.f32 %v1319_v45, %v957_v3 }
 0x30c   : > { %v1321_v48 = vpop.eup %1320 }
 0x30d   : > { %v955_v27 = vmul.f32 0.6931472, %v1321_v48 }
 0x30f   : > { %v961_v43 = vsel %vm960_vm1, %v958_v39, %v955_v27 }
 0x310   : > { %v962_v26 = vsub.f32 %v948_v31, %v961_v43 }
 0x312   : > { %v964_v11 = vadd.f32 %v963_v16, %v962_v26  ;;  %966 = vst.msk [vmem:[#allocation3 + $0x1] sm:$0x1] %vm841_vm5, %v962_v26 }
 0x314   : > { %965 = vst.msk [vmem:[#allocation3] sm:$0x1] %vm841_vm5, %v964_v11 }
 0x315 PF: > { %p1954_p7 = scmp.eq.s32.totalorder %s1057_s15, 2  ;;  %s1378_s5 = smov [#allocation3]  }
 0x316   : > { %s977_s6 = sshll.u32 %s1378_s5, 4  ;;  %s978_s6 = int_to_ptr.vmem [resolvable:$true] %s977_s6 }
 0x317   : > { %s1322_s7 = scalar_lea.vmem %s978_s6, 64  ;;  %p1329_p11 = scmp.lt.s32.totalorder %s978_s6, %s978_s6 }
 0x318   : > { %p1323_p8 = scmp.ne.s32.totalorder %s978_s6, %s1322_s7  ;;  %p1330_p12 = scmp.lt.s32.totalorder %s1322_s7, %s1322_s7 }
 0x31a   : > { %p1324_p9 = pnand %p1323_p8, %p1954_p7  ;;  %p1331_p13 = por %p1330_p12, %p1329_p11 }
 0x31c   : > { %p1325_p10 = pneg %p1324_p9 }
 0x31e   : > { %p1332_p0 = pnand %p1331_p13, %p1325_p10 }
 0x320   : > { %1335 = shalt.err (!%p1332_p0)
}
 0x321   : > { %1220 = dma.vmem_to_hbm [thread:$0]  (%p1954_p7), %s978_s6, 64, %s1981_s3, [#allocation4]  }
 0x322   : > { %1359 = dma.done.wait (%p1954_p7), [#allocation4], 64  }
 0x323   : > { %1361 = vsyncadd (%p1954_p7), [#allocation4], 4294967232 }
 0x324 PF: > { %s14_s14 = sadd.s32 1, %s1372_s14   ;;  %s2098_s12 = smov %s1368_s13 }
 0x325   : > { %p11_p1 = scmp.ge.s32.totalorder %s14_s14, 5   ;;  %s2099_s13 = smov %s2101_s16 }
 0x327   :  { %13 = sbr.rel (!%p11_p1) target bundleno = 2 (0x2), region = 74 }
 0x32c   :  { %990 = vsyncpa [#allocation4], 1 }
 0x32d   :  { %992 = vsyncpa [#allocation4 + $0x1], 1 }

</bundles_post_ra>
